<compile_context>
chip_gen: v7x
topology: tpu7x:2x2x1
jax: 0.10.0
libtpu: 0.0.40
codegen_flags: <defaults>
</compile_context>

<pallas_src>
import jax
import jax.numpy as jnp
from jax.experimental import pallas as pl
from jax.experimental.pallas import tpu as pltpu


def _round_up(n, m):
    return pl.cdiv(n, m) * m


def _vmem_capacity_bytes():
    """Per-core VMEM capacity; conservative fallback = v7x per-TC (64 MiB)."""
    try:
        cap = getattr(pltpu.get_tpu_info(), "vmem_capacity_bytes", None)
        if cap:
            return int(cap)
    except Exception:
        pass
    return 64 * 1024 * 1024


def ffn_kernel(x_ref, w1_ref, b1_ref, w2_ref, b2_ref, o_ref, acc_ref):
    j = pl.program_id(1)                 # d_ff reduction step (last, "arbitrary")

    @pl.when(j == 0)
    def _():
        acc_ref[...] = jnp.zeros_like(acc_ref)

    # fc1 slice: (rows, d_model) @ (d_model, ff_tile), bf16 operands, f32 acc.
    h = jnp.dot(x_ref[...], w1_ref[...], preferred_element_type=jnp.float32)
    h = jnp.maximum(h + b1_ref[...], 0.0)          # bias + ReLU in f32
    # Dropout: identity (eval mode).

    # fc2 partial: (rows, ff_tile) @ (ff_tile, d_model), accumulate in f32.
    acc_ref[...] += jnp.dot(h.astype(w2_ref.dtype), w2_ref[...],
                            preferred_element_type=jnp.float32)

    @pl.when(j == pl.num_programs(1) - 1)
    def _():
        o_ref[...] = (acc_ref[...] + b2_ref[...]).astype(o_ref.dtype)


def make_position_wise_ffn(w1, b1, w2, b2, *, row_tile=512, ff_tile=1024,
                           compute_dtype=jnp.bfloat16):
    """Pads/casts the FFN parameters once; returns ffn(x) -> (b, s, d_model).

    Weights are stored pre-transposed: w1 (d_model, d_ff), w2 (d_ff, d_model),
    matching PyTorch's x @ W.T semantics.
    """
    d_model, d_ff = w1.shape
    assert w2.shape == (d_ff, d_model)

    w_item = jnp.dtype(compute_dtype).itemsize
    d_model_p = _round_up(d_model, 128)            # lane-dense feature dims

    # ---- VMEM budgeting ----------------------------------------------------
    vmem_cap = _vmem_capacity_bytes()
    vmem_limit = min(int(vmem_cap * 0.80), 110 * 1024 * 1024)
    tile_budget = int(vmem_limit * 0.85)

    out_item_worst = 4
    fixed = (2 * row_tile * d_model_p * w_item           # x tile, 2 buffers
             + 2 * row_tile * d_model_p * out_item_worst  # out tile, 2 buffers
             + row_tile * d_model_p * 4)                  # f32 accumulator
    per_ff_col = (4 * d_model_p * w_item                  # W1+W2 tiles, 2 bufs
                  + 2 * 4                                 # b1 (f32), 2 bufs
                  + row_tile * 4)                         # f32 hidden h
    max_ff = max(128, ((tile_budget - fixed) // per_ff_col) // 128 * 128)

    ff_tile = max(128, min(ff_tile, _round_up(d_ff, 128), max_ff))
    # Pad d_ff UP to a multiple of ff_tile (zero pad is neutral) instead of
    # shrinking ff_tile for awkward d_ff values.
    d_ff_p = _round_up(d_ff, ff_tile)

    # ---- Pad + cast parameters once (not per forward call) -----------------
    w1_p = jnp.pad(w1, ((0, d_model_p - d_model), (0, d_ff_p - d_ff))
                   ).astype(compute_dtype)
    w2_p = jnp.pad(w2, ((0, d_ff_p - d_ff), (0, d_model_p - d_model))
                   ).astype(compute_dtype)
    b1_p = jnp.pad(b1.reshape(1, d_ff), ((0, 0), (0, d_ff_p - d_ff))
                   ).astype(jnp.float32)
    b2_p = jnp.pad(b2.reshape(1, d_model), ((0, 0), (0, d_model_p - d_model))
                   ).astype(jnp.float32)

    def ffn(x):
        batch, seq, dm = x.shape
        assert dm == d_model
        out_dtype = x.dtype
        n_rows = batch * seq

        # Row tiling: 128-row floor, big MXU-sized blocks, and >= 2 row tiles
        # when rows permit so the "parallel" axis shards across both v7x TCs.
        n_rows_128 = _round_up(n_rows, 128)
        rt = min(row_tile, n_rows_128)
        n_tiles = pl.cdiv(n_rows_128, rt)
        if n_tiles == 1 and n_rows_128 >= 256:
            n_tiles = 2
        rt = _round_up(pl.cdiv(n_rows_128, n_tiles), 128)
        n_tiles = pl.cdiv(n_rows_128, rt)
        n_rows_p = n_tiles * rt

        x2d = jnp.pad(x.reshape(n_rows, d_model),
                      ((0, n_rows_p - n_rows), (0, d_model_p - d_model))
                      ).astype(compute_dtype)

        grid = (n_tiles, d_ff_p // ff_tile)

        out_item = jnp.dtype(out_dtype).itemsize
        cost = pl.CostEstimate(
            flops=2 * n_rows_p * d_model_p * d_ff_p * 2,
            transcendentals=0,
            bytes_accessed=(n_rows_p * d_model_p * (w_item + out_item)
                            + (w1_p.size + w2_p.size) * w_item * n_tiles),
        )

        out2d = pl.pallas_call(
            ffn_kernel,
            out_shape=jax.ShapeDtypeStruct((n_rows_p, d_model_p), out_dtype),
            grid_spec=pltpu.PrefetchScalarGridSpec(
                num_scalar_prefetch=0,
                grid=grid,
                in_specs=[
                    pl.BlockSpec((rt, d_model_p), lambda i, j: (i, 0)),       # x
                    pl.BlockSpec((d_model_p, ff_tile), lambda i, j: (0, j)),  # W1
                    pl.BlockSpec((1, ff_tile), lambda i, j: (0, j)),          # b1
                    pl.BlockSpec((ff_tile, d_model_p), lambda i, j: (j, 0)),  # W2
                    pl.BlockSpec((1, d_model_p), lambda i, j: (0, 0)),        # b2
                ],
                out_specs=pl.BlockSpec((rt, d_model_p), lambda i, j: (i, 0)),
                scratch_shapes=[pltpu.VMEM((rt, d_model_p), jnp.float32)],
            ),
            compiler_params=pltpu.CompilerParams(
                dimension_semantics=("parallel", "arbitrary"),
                vmem_limit_bytes=vmem_limit,
            ),
            cost_estimate=cost,
        )(x2d, w1_p, b1_p, w2_p, b2_p)

        return out2d[:n_rows, :d_model].reshape(batch, seq, d_model)

    return ffn


if __name__ == "__main__":
    # Small deterministic setup consistent with the module.
    batch, seq, d_model, d_ff = 2, 8, 32, 64

    key = jax.random.PRNGKey(0)
    k_x, k_w1, k_b1, k_w2, k_b2 = jax.random.split(key, 5)

    x = jax.random.normal(k_x, (batch, seq, d_model), dtype=jnp.float32)
    # nn.Linear-style init (uniform in +/- 1/sqrt(fan_in)), stored pre-transposed.
    lim1 = 1.0 / (d_model ** 0.5)
    lim2 = 1.0 / (d_ff ** 0.5)
    w1 = jax.random.uniform(k_w1, (d_model, d_ff), jnp.float32, -lim1, lim1)
    b1 = jax.random.uniform(k_b1, (d_ff,), jnp.float32, -lim1, lim1)
    w2 = jax.random.uniform(k_w2, (d_ff, d_model), jnp.float32, -lim2, lim2)
    b2 = jax.random.uniform(k_b2, (d_model,), jnp.float32, -lim2, lim2)

    ffn = make_position_wise_ffn(w1, b1, w2, b2)
    out = jax.block_until_ready(ffn(x))

    # Pure-JAX f32 reference (eval-mode dropout == identity); bf16 compute
    # tolerance.
    ref = jnp.maximum(x @ w1 + b1, 0.0) @ w2 + b2
    assert out.shape == (batch, seq, d_model)
    assert jnp.allclose(out, ref, atol=3e-2, rtol=3e-2), \
        float(jnp.max(jnp.abs(out - ref)))

    print("KERNEL_OK")
</pallas_src>

<mosaic_0001>
module attributes {stable_mosaic.version = 11 : i64} {
  func.func @ffn_kernel(%arg0: i32, %arg1: i32, %arg2: memref<128x128xbf16, #tpu.memory_space<vmem>>, %arg3: memref<128x128xbf16, #tpu.memory_space<vmem>>, %arg4: memref<1x128xf32, #tpu.memory_space<vmem>>, %arg5: memref<128x128xbf16, #tpu.memory_space<vmem>>, %arg6: memref<1x128xf32, #tpu.memory_space<vmem>>, %arg7: memref<128x128xf32, #tpu.memory_space<vmem>>, %arg8: memref<128x128xf32, #tpu.memory_space<vmem>>) attributes {dimension_semantics = [#tpu.dimension_semantics<parallel>, #tpu.dimension_semantics<arbitrary>], iteration_bounds = array<i64: 1, 1>, scalar_prefetch = 0 : i64, scratch_operands = 1 : i64, tpu.core_type = #tpu.core_type<tc>, window_params = [{transform_indices = @transform_0, window_bounds = array<i64: 128, 128>}, {transform_indices = @transform_1, window_bounds = array<i64: 128, 128>}, {transform_indices = @transform_2, window_bounds = array<i64: 1, 128>}, {transform_indices = @transform_3, window_bounds = array<i64: 128, 128>}, {pipeline_mode = #tpu.pipeline_mode<synchronous>, transform_indices = @transform_4, window_bounds = array<i64: 1, 128>}, {transform_indices = @transform_5, window_bounds = array<i64: 128, 128>}]} {
    %c0_i32 = arith.constant 0 : i32
    %0 = arith.cmpi eq, %arg1, %c0_i32 : i32
    %1 = arith.extui %0 : i1 to i32
    %c0_i32_0 = arith.constant 0 : i32
    %2 = arith.cmpi ne, %1, %c0_i32_0 : i32
    scf.if %2 {
      %cst_16 = arith.constant 0.000000e+00 : f32
      %20 = vector.broadcast %cst_16 : f32 to vector<128x128xf32>
      %c0_17 = arith.constant 0 : index
      %c0_18 = arith.constant 0 : index
      %21 = vector.load %arg8[%c0_17, %c0_18] : memref<128x128xf32, #tpu.memory_space<vmem>>, vector<128x128xf32>
      tpu.vector_store %arg8[%c0_17, %c0_18], %20 {strides = array<i32>} : memref<128x128xf32, #tpu.memory_space<vmem>>, vector<128x128xf32>,
    } else {
    }
    %c0 = arith.constant 0 : index
    %c0_1 = arith.constant 0 : index
    %3 = vector.load %arg2[%c0, %c0_1] : memref<128x128xbf16, #tpu.memory_space<vmem>>, vector<128x128xbf16>
    %c0_2 = arith.constant 0 : index
    %c0_3 = arith.constant 0 : index
    %4 = vector.load %arg3[%c0_2, %c0_3] : memref<128x128xbf16, #tpu.memory_space<vmem>>, vector<128x128xbf16>
    %cst = arith.constant dense<0.000000e+00> : vector<128x128xf32>
    %5 = tpu.matmul %3, %4, %cst {dimension_numbers = #tpu.dot_dimension_numbers<[1], [0], [0], [1], [0, 0, 1, 1], [], []>} : vector<128x128xbf16>, vector<128x128xbf16>, vector<128x128xf32> -> vector<128x128xf32>
    %c0_4 = arith.constant 0 : index
    %c0_5 = arith.constant 0 : index
    %6 = vector.load %arg4[%c0_4, %c0_5] : memref<1x128xf32, #tpu.memory_space<vmem>>, vector<1x128xf32>
    %7 = vector.broadcast %6 : vector<1x128xf32> to vector<128x128xf32>
    %8 = arith.addf %5, %7 : vector<128x128xf32>
    %cst_6 = arith.constant 0.000000e+00 : f32
    %9 = vector.broadcast %cst_6 : f32 to vector<128x128xf32>
    %10 = arith.maximumf %8, %9 : vector<128x128xf32>
    %c0_7 = arith.constant 0 : index
    %c0_8 = arith.constant 0 : index
    %11 = vector.load %arg8[%c0_7, %c0_8] : memref<128x128xf32, #tpu.memory_space<vmem>>, vector<128x128xf32>
    %12 = arith.truncf %10 : vector<128x128xf32> to vector<128x128xbf16>
    %c0_9 = arith.constant 0 : index
    %c0_10 = arith.constant 0 : index
    %13 = vector.load %arg5[%c0_9, %c0_10] : memref<128x128xbf16, #tpu.memory_space<vmem>>, vector<128x128xbf16>
    %cst_11 = arith.constant dense<0.000000e+00> : vector<128x128xf32>
    %14 = tpu.matmul %12, %13, %cst_11 {dimension_numbers = #tpu.dot_dimension_numbers<[1], [0], [0], [1], [0, 0, 1, 1], [], []>} : vector<128x128xbf16>, vector<128x128xbf16>, vector<128x128xf32> -> vector<128x128xf32>
    %15 = arith.addf %11, %14 : vector<128x128xf32>
    %c0_12 = arith.constant 0 : index
    %c0_13 = arith.constant 0 : index
    %16 = vector.load %arg8[%c0_12, %c0_13] : memref<128x128xf32, #tpu.memory_space<vmem>>, vector<128x128xf32>
    tpu.vector_store %arg8[%c0_12, %c0_13], %15 {strides = array<i32>} : memref<128x128xf32, #tpu.memory_space<vmem>>, vector<128x128xf32>,
    %c0_i32_14 = arith.constant 0 : i32
    %17 = arith.cmpi eq, %arg1, %c0_i32_14 : i32
    %18 = arith.extui %17 : i1 to i32
    %c0_i32_15 = arith.constant 0 : i32
    %19 = arith.cmpi ne, %18, %c0_i32_15 : i32
    scf.if %19 {
      %c0_16 = arith.constant 0 : index
      %c0_17 = arith.constant 0 : index
      %20 = vector.load %arg8[%c0_16, %c0_17] : memref<128x128xf32, #tpu.memory_space<vmem>>, vector<128x128xf32>
      %c0_18 = arith.constant 0 : index
      %c0_19 = arith.constant 0 : index
      %21 = vector.load %arg6[%c0_18, %c0_19] : memref<1x128xf32, #tpu.memory_space<vmem>>, vector<1x128xf32>
      %22 = vector.broadcast %21 : vector<1x128xf32> to vector<128x128xf32>
      %23 = arith.addf %20, %22 : vector<128x128xf32>
      %c0_20 = arith.constant 0 : index
      %c0_21 = arith.constant 0 : index
      %24 = vector.load %arg7[%c0_20, %c0_21] : memref<128x128xf32, #tpu.memory_space<vmem>>, vector<128x128xf32>
      tpu.vector_store %arg7[%c0_20, %c0_21], %23 {strides = array<i32>} : memref<128x128xf32, #tpu.memory_space<vmem>>, vector<128x128xf32>,
    } else {
    }
    return
  }
  func.func @transform_0(%arg0: i32, %arg1: i32) -> (i32, i32) {
    %c0_i32 = arith.constant 0 : i32
    %c0_i32_0 = arith.constant 0 : i32
    return %arg0, %c0_i32 : i32, i32
  }
  func.func @transform_1(%arg0: i32, %arg1: i32) -> (i32, i32) {
    %c0_i32 = arith.constant 0 : i32
    %c0_i32_0 = arith.constant 0 : i32
    return %c0_i32, %arg1 : i32, i32
  }
  func.func @transform_2(%arg0: i32, %arg1: i32) -> (i32, i32) {
    %c0_i32 = arith.constant 0 : i32
    %c0_i32_0 = arith.constant 0 : i32
    return %c0_i32, %arg1 : i32, i32
  }
  func.func @transform_3(%arg0: i32, %arg1: i32) -> (i32, i32) {
    %c0_i32 = arith.constant 0 : i32
    %c0_i32_0 = arith.constant 0 : i32
    return %arg1, %c0_i32 : i32, i32
  }
  func.func @transform_4(%arg0: i32, %arg1: i32) -> (i32, i32) {
    %c0_i32 = arith.constant 0 : i32
    %c0_i32_0 = arith.constant 0 : i32
    %c0_i32_1 = arith.constant 0 : i32
    return %c0_i32, %c0_i32_0 : i32, i32
  }
  func.func @transform_5(%arg0: i32, %arg1: i32) -> (i32, i32) {
    %c0_i32 = arith.constant 0 : i32
    %c0_i32_0 = arith.constant 0 : i32
    return %arg0, %c0_i32 : i32, i32
  }
}

</mosaic_0001>

<bundles_post_ra>
// kernel: tpu_custom_call.1
= control target key start
LH: loop header
LB: loop body
LE: loop exit
PB: predicated region body
PF: predicated region fallthrough
CT: control target
= control target key end

     0   :  { %10 = vsyncpa [#allocation4], 0  ;;  %s980_s0 = inlined_call_operand.hbm [shape: bf16[128,128], index: 0, kind: input, shape index: {}]   ;;  %s981_s1 = inlined_call_operand.hbm [shape: bf16[128,128], index: 1, kind: input, shape index: {}]   ;;  %s982_s2 = inlined_call_operand.vmem [shape: f32[1,128], index: 2, kind: input, shape index: {}]   ;;  %s983_s3 = inlined_call_operand.hbm [shape: bf16[128,128], index: 3, kind: input, shape index: {}]   ;;  %s984_s4 = inlined_call_operand.vmem [shape: f32[1,128], index: 4, kind: input, shape index: {}]   ;;  %s985_s5 = inlined_call_operand.hbm [shape: f32[128,128], index: 5, kind: output, shape index: {}]  }
   0x1   :  { %11 = vsyncpa [#allocation7], 0 }
   0x2   :  { %12 = vsyncpa [#allocation5], 0  ;;  %s872_s18 = smov [#allocation6]   ;;  %s873_s20 = smov [#allocation3]  }
   0x3   :  { %s30_s19 = sshll.u32 %s872_s18, 4  ;;  %s18_s21 = sshll.u32 %s873_s20, 4  ;;  %s31_s19 = int_to_ptr.vmem [resolvable:$true] %s30_s19  ;;  %s910_s21 = int_to_ptr.vmem [resolvable:$true] %s18_s21 }
   0x4   :  { %s778_s24 = scalar_lea.hbm %s981_s1, 1024 }
   0x5   :  { %p779_p0 = scmp.ne.s32.totalorder %s981_s1, %s778_s24  ;;  %p782_p1 = scmp.lt.u32.totalorder %s778_s24, %s981_s1 }
   0x7   :  { %p784_p2 = pnand %p782_p1, %p779_p0 }
   0x9   :  { %787 = shalt.err (!%p784_p2)
}
   0xa   :  { %s788_s29 = scalar_lea.vmem %s31_s19, 1024  ;;  %p793_p4 = scmp.lt.s32.totalorder %s31_s19, %s31_s19 }
   0xb   :  { %p789_p3 = scmp.ne.s32.totalorder %s31_s19, %s788_s29  ;;  %p794_p5 = scmp.lt.s32.totalorder %s788_s29, %s788_s29 }
   0xd   :  { %p795_p6 = por %p794_p5, %p793_p4 }
   0xf   :  { %p796_p7 = pnand %p795_p6, %p789_p3 }
  0x11   :  { %799 = shalt.err (!%p796_p7)
}
  0x12   :  { %s874_s30 = smov 64   ;;  %s875_s6 = smov 4  }
  0x13   :  { %36 = dma.hbm_to_vmem [thread:$0]  %s981_s1, 1024, %s31_s19, [#allocation7], %s874_s30, %s874_s30, %s875_s6  }
  0x14   :  { %s800_s11 = scalar_lea.hbm %s980_s0, 1024 }
  0x15   :  { %p801_p8 = scmp.ne.s32.totalorder %s980_s0, %s800_s11  ;;  %p804_p9 = scmp.lt.u32.totalorder %s800_s11, %s980_s0 }
  0x17   :  { %p806_p10 = pnand %p804_p9, %p801_p8 }
  0x19   :  { %809 = shalt.err (!%p806_p10)
}
  0x1a   :  { %s810_s16 = scalar_lea.vmem %s910_s21, 1024  ;;  %p815_p12 = scmp.lt.s32.totalorder %s910_s21, %s910_s21 }
  0x1b   :  { %p811_p11 = scmp.ne.s32.totalorder %s910_s21, %s810_s16  ;;  %p816_p13 = scmp.lt.s32.totalorder %s810_s16, %s810_s16 }
  0x1d   :  { %p817_p0 = por %p816_p13, %p815_p12 }
  0x1f   :  { %p818_p1 = pnand %p817_p0, %p811_p11 }
  0x21   :  { %821 = shalt.err (!%p818_p1)
}
  0x22   :  { %24 = dma.hbm_to_vmem [thread:$0]  %s980_s0, 1024, %s910_s21, [#allocation4], %s874_s30, %s874_s30, %s875_s6  }
  0x23   :  { %s876_s18 = smov [#allocation8]   ;;  %s822_s23 = scalar_lea.hbm %s983_s3, 1024 }
  0x24   :  { %s44_s19 = sshll.u32 %s876_s18, 4  ;;  %p823_p2 = scmp.ne.s32.totalorder %s983_s3, %s822_s23  ;;  %s45_s19 = int_to_ptr.vmem [resolvable:$true] %s44_s19 }
  0x25   :  { %p826_p3 = scmp.lt.u32.totalorder %s822_s23, %s983_s3 }
  0x27   :  { %p828_p4 = pnand %p826_p3, %p823_p2 }
  0x29   :  { %831 = shalt.err (!%p828_p4)
}
  0x2a   :  { %s832_s28 = scalar_lea.vmem %s45_s19, 1024  ;;  %p837_p6 = scmp.lt.s32.totalorder %s45_s19, %s45_s19 }
  0x2b   :  { %p833_p5 = scmp.ne.s32.totalorder %s45_s19, %s832_s28  ;;  %p838_p7 = scmp.lt.s32.totalorder %s832_s28, %s832_s28 }
  0x2d   :  { %p839_p8 = por %p838_p7, %p837_p6 }
  0x2f   :  { %p840_p9 = pnand %p839_p8, %p833_p5 }
  0x31   :  { %843 = shalt.err (!%p840_p9)
}
  0x32   :  { %50 = dma.hbm_to_vmem [thread:$0]  %s983_s3, 1024, %s45_s19, [#allocation7], %s874_s30, %s874_s30, %s875_s6  }
  0x33   :  { %866 = dma.done.wait [#allocation4], 1024  }
  0x34   :  { %867 = vsyncadd [#allocation4], 4294966272 }
  0x35   :  { %868 = dma.done.wait [#allocation7], 2048  }
  0x36   :  { %869 = vsyncadd [#allocation7], 4294965248  ;;  %v754_v0 = vld [vmem:[#allocation6] sm:$0xff]   ;;  %v755_v1 = vld [vmem:[#allocation6 + $0x8] sm:$0xff]  }
  0x37   :  { %682 = vmatprep.subr.bf16.mxu0 %v754_v0  ;;  %v756_v2 = vld [vmem:[#allocation6 + $0x10] sm:$0xff]   ;;  %v757_v3 = vld [vmem:[#allocation6 + $0x18] sm:$0xff]   ;;  %v762_v4 = vld [vmem:[#allocation3] sm:$0xff]  }
  0x38   :  { %683 = vmatpush3.bf16.msra.mxu0 %v754_v0  ;;  %698 = vmatprep.mubr.bf16.mxu0 %v762_v4  ;;  %v758_v5 = vld [vmem:[#allocation6 + $0x20] sm:$0xff]   ;;  %v759_v6 = vld [vmem:[#allocation6 + $0x28] sm:$0xff]   ;;  %v760_v9 = vld [vmem:[#allocation6 + $0x30] sm:$0xff]  }
  0x39   :  { %684 = vmatprep.subr.bf16.mxu0 %v755_v1  ;;  %v770_v7 = vld [vmem:[#allocation8] sm:$0xff]   ;;  %v771_v8 = vld [vmem:[#allocation8 + $0x8] sm:$0xff]   ;;  %v772_v10 = vld [vmem:[#allocation8 + $0x10] sm:$0xff]  }
  0x3a   :  { %714 = vmatprep.subr.bf16.mxu1 %v770_v7  ;;  %v761_v11 = vld [vmem:[#allocation6 + $0x38] sm:$0xff]   ;;  %v774_v13 = vld [vmem:[#allocation8 + $0x20] sm:$0xff]   ;;  %v763_v14 = vld [vmem:[#allocation3 + $0x8] sm:$0xff]  }
  0x3b   :  { %715 = vmatpush3.bf16.msra.mxu1 %v770_v7  ;;  %v773_v12 = vld [vmem:[#allocation8 + $0x18] sm:$0xff]   ;;  %v764_v15 = vld [vmem:[#allocation3 + $0x10] sm:$0xff]   ;;  %v775_v16 = vld [vmem:[#allocation8 + $0x28] sm:$0xff]  }
  0x3c   :  { %685 = vmatpush3.bf16.msra.mxu0 %v755_v1  ;;  %716 = vmatprep.subr.bf16.mxu1 %v771_v8  ;;  %v765_v17 = vld [vmem:[#allocation3 + $0x18] sm:$0xff]   ;;  %v766_v18 = vld [vmem:[#allocation3 + $0x20] sm:$0xff]   ;;  %v767_v19 = vld [vmem:[#allocation3 + $0x28] sm:$0xff]  }
  0x3d   :  { %686 = vmatprep.subr.bf16.mxu0 %v756_v2  ;;  %v768_v20 = vld [vmem:[#allocation3 + $0x30] sm:$0xff]   ;;  %v769_v21 = vld [vmem:[#allocation3 + $0x38] sm:$0xff]   ;;  %v624_v24 = vld [vmem:[%s982_s2] ss:$0 sm:$0xff] }
  0x3e   :  { %v776_v22 = vld [vmem:[#allocation8 + $0x30] sm:$0xff]   ;;  %v777_v23 = vld [vmem:[#allocation8 + $0x38] sm:$0xff]  }
  0x3f   :  { %717 = vmatpush3.bf16.msra.mxu1 %v771_v8 }
  0x40   :  { %687 = vmatpush3.bf16.msra.mxu0 %v756_v2  ;;  %718 = vmatprep.subr.bf16.mxu1 %v772_v10 }
  0x41   :  { %688 = vmatprep.subr.bf16.mxu0 %v757_v3 }
  0x43   :  { %719 = vmatpush3.bf16.msra.mxu1 %v772_v10 }
  0x44   :  { %689 = vmatpush3.bf16.msra.mxu0 %v757_v3  ;;  %720 = vmatprep.subr.bf16.mxu1 %v773_v12 }
  0x45   :  { %690 = vmatprep.subr.bf16.mxu0 %v758_v5 }
  0x47   :  { %721 = vmatpush3.bf16.msra.mxu1 %v773_v12 }
  0x48   :  { %691 = vmatpush3.bf16.msra.mxu0 %v758_v5  ;;  %722 = vmatprep.subr.bf16.mxu1 %v774_v13 }
  0x49   :  { %692 = vmatprep.subr.bf16.mxu0 %v759_v6 }
  0x4b   :  { %723 = vmatpush3.bf16.msra.mxu1 %v774_v13 }
  0x4c   :  { %693 = vmatpush3.bf16.msra.mxu0 %v759_v6  ;;  %724 = vmatprep.subr.bf16.mxu1 %v775_v16 }
  0x4d   :  { %694 = vmatprep.subr.bf16.mxu0 %v760_v9 }
  0x4f   :  { %725 = vmatpush3.bf16.msra.mxu1 %v775_v16 }
  0x50   :  { %695 = vmatpush3.bf16.msra.mxu0 %v760_v9  ;;  %726 = vmatprep.subr.bf16.mxu1 %v776_v22 }
  0x51   :  { %696 = vmatprep.subr.bf16.mxu0 %v761_v11 }
  0x53   :  { %727 = vmatpush3.bf16.msra.mxu1 %v776_v22 }
  0x54   :  { %697 = vmatpush3.bf16.msra.mxu0 %v761_v11  ;;  %728 = vmatprep.subr.bf16.mxu1 %v777_v23 }
  0x57   :  { %699 = vmatmul.mubr.bf16.vlgmr.msra.gmra.mrb[0].mxu0 %v763_v14  ;;  %729 = vmatpush3.bf16.msra.mxu1 %v777_v23 }
  0x58   :  { %702 = vmatprep.mubr.bf16.mxu0 %v764_v15 }
  0x5f   :  { %703 = vmatmul.mubr.bf16.gmra.mrb[4].mxu0 %v765_v17  ;;  %v649_v17 = vld [vmem:[%s984_s4] ss:$0 sm:$0xff]  ;;  %s877_s4 = smov [#allocation9]  }
  0x60   :  { %706 = vmatprep.mubr.bf16.mxu0 %v766_v18  ;;  %s611_s6 = sshll.u32 %s877_s4, 4  ;;  %s612_s6 = int_to_ptr.vmem [resolvable:$true] %s611_s6 }
  0x61   :  { %s844_s7 = scalar_lea.vmem %s612_s6, 2048  ;;  %p849_p11 = scmp.lt.s32.totalorder %s612_s6, %s612_s6 }
  0x62   :  { %p845_p10 = scmp.ne.s32.totalorder %s612_s6, %s844_s7  ;;  %p850_p12 = scmp.lt.s32.totalorder %s844_s7, %s844_s7 }
  0x64   :  { %p851_p13 = por %p850_p12, %p849_p11 }
  0x66   :  { %p852_p0 = pnand %p851_p13, %p845_p10 }
  0x67   :  { %707 = vmatmul.mubr.bf16.gmra.mrb[8].mxu0 %v767_v19 }
  0x68   :  { %710 = vmatprep.mubr.bf16.mxu0 %v768_v20 }
  0x6f   :  { %711 = vmatmul.mubr.bf16.gmra.mrb[12].mxu0 %v769_v21 }
 0x12a   :  { %v700_v25 = vpop.f32.mrb[0].mxu0 }
 0x12b   :  { %v261_v26 = vadd.f32 %v700_v25, %v624_v24  ;;  %v252_v27 = vpop.f32.mrb[1].mxu0 }
 0x12c   :  { %v253_v28 = vadd.f32 %v624_v24, %v252_v27  ;;  %v701_v29 = vpop.f32.mrb[2].mxu0 }
 0x12d   :  { %v264_v30 = vadd.f32 %v701_v29, %v624_v24  ;;  %v255_v31 = vpop.f32.mrb[3].mxu0  ;;  %v317_v33 = vmax.f32 %v261_v26, 0.0 }
 0x12e   :  { %v256_v32 = vadd.f32 %v624_v24, %v255_v31  ;;  %v315_v35 = vmax.f32 %v253_v28, 0.0 }
 0x12f   :  { %v318_v34 = vmax.f32 %v264_v30, 0.0 }
 0x130   :  { %v316_v36 = vmax.f32 %v256_v32, 0.0 }
 0x131   :  { %v348_v37 = vpack.c.bf16 %v318_v34, %v317_v33 }
 0x132   :  { %v704_v38 = vpop.f32.mrb[4].mxu0  ;;  %v347_v39 = vpack.c.bf16 %v316_v36, %v315_v35 }
 0x133   :  { %v277_v40 = vadd.f32 %v704_v38, %v624_v24  ;;  %v268_v41 = vpop.f32.mrb[5].mxu0 }
 0x134   :  { %v269_v42 = vadd.f32 %v624_v24, %v268_v41  ;;  %v705_v43 = vpop.f32.mrb[6].mxu0  ;;  %730 = vmatprep.mubr.bf16.mxu1 %v347_v39 }
 0x135   :  { %v280_v44 = vadd.f32 %v705_v43, %v624_v24  ;;  %v271_v45 = vpop.f32.mrb[7].mxu0  ;;  %731 = vmatmul.mubr.bf16.vlgmr.msra.gmra.mrb[0].mxu1 %v348_v37  ;;  %v321_v47 = vmax.f32 %v277_v40, 0.0 }
 0x136   :  { %v272_v46 = vadd.f32 %v624_v24, %v271_v45  ;;  %v319_v49 = vmax.f32 %v269_v42, 0.0 }
 0x137   :  { %v322_v48 = vmax.f32 %v280_v44, 0.0 }
 0x138   :  { %v320_v50 = vmax.f32 %v272_v46, 0.0 }
 0x139   :  { %v350_v51 = vpack.c.bf16 %v322_v48, %v321_v47 }
 0x13a   :  { %v349_v52 = vpack.c.bf16 %v320_v50, %v319_v49  ;;  %v708_v53 = vpop.f32.mrb[8].mxu0 }
 0x13b   :  { %v293_v54 = vadd.f32 %v708_v53, %v624_v24  ;;  %v284_v55 = vpop.f32.mrb[9].mxu0 }
 0x13c   :  { %v285_v56 = vadd.f32 %v624_v24, %v284_v55  ;;  %v709_v57 = vpop.f32.mrb[10].mxu0  ;;  %734 = vmatprep.mubr.bf16.mxu1 %v349_v52 }
 0x13d   :  { %v296_v58 = vadd.f32 %v709_v57, %v624_v24  ;;  %v287_v59 = vpop.f32.mrb[11].mxu0  ;;  %735 = vmatmul.mubr.bf16.gmra.mrb[4].mxu1 %v350_v51  ;;  %v325_v61 = vmax.f32 %v293_v54, 0.0 }
 0x13e   :  { %v288_v60 = vadd.f32 %v624_v24, %v287_v59  ;;  %v323_v63 = vmax.f32 %v285_v56, 0.0 }
 0x13f   :  { %v326_v62 = vmax.f32 %v296_v58, 0.0 }
 0x140   :  { %v324_v0 = vmax.f32 %v288_v60, 0.0 }
 0x141   :  { %v352_v1 = vpack.c.bf16 %v326_v62, %v325_v61 }
 0x142   :  { %v351_v2 = vpack.c.bf16 %v324_v0, %v323_v63  ;;  %v712_v3 = vpop.f32.mrb[12].mxu0 }
 0x143   :  { %v309_v4 = vadd.f32 %v712_v3, %v624_v24  ;;  %v300_v5 = vpop.f32.mrb[13].mxu0 }
 0x144   :  { %v301_v6 = vadd.f32 %v624_v24, %v300_v5  ;;  %v713_v7 = vpop.f32.mrb[14].mxu0  ;;  %738 = vmatprep.mubr.bf16.mxu1 %v351_v2 }
 0x145   :  { %v312_v8 = vadd.f32 %v713_v7, %v624_v24  ;;  %v303_v9 = vpop.f32.mrb[15].mxu0  ;;  %739 = vmatmul.mubr.bf16.gmra.mrb[8].mxu1 %v352_v1  ;;  %v329_v11 = vmax.f32 %v309_v4, 0.0 }
 0x146   :  { %v304_v10 = vadd.f32 %v624_v24, %v303_v9  ;;  %v327_v13 = vmax.f32 %v301_v6, 0.0 }
 0x147   :  { %v330_v12 = vmax.f32 %v312_v8, 0.0 }
 0x148   :  { %v328_v14 = vmax.f32 %v304_v10, 0.0 }
 0x149   :  { %v354_v15 = vpack.c.bf16 %v330_v12, %v329_v11 }
 0x14a   :  { %v353_v16 = vpack.c.bf16 %v328_v14, %v327_v13 }
 0x14c   :  { %742 = vmatprep.mubr.bf16.mxu1 %v353_v16 }
 0x14d   :  { %743 = vmatmul.mubr.bf16.gmra.mrb[12].mxu1 %v354_v15 }
 0x208   :  { %v732_v18 = vpop.f32.mrb[0].mxu1 }
 0x209   :  { %v576_v19 = vadd.f32 %v732_v18, %v649_v17  ;;  %v453_v20 = vpop.f32.mrb[1].mxu1 }
 0x20a   :  { %v574_v21 = vadd.f32 %v649_v17, %v453_v20  ;;  %v733_v22 = vpop.f32.mrb[2].mxu1 }
 0x20b   :  { %592 = vst [vmem:[#allocation9 + $0x10] sm:$0xff] %v576_v19  ;;  %v577_v23 = vadd.f32 %v733_v22, %v649_v17  ;;  %v456_v24 = vpop.f32.mrb[3].mxu1 }
 0x20c   :  { %590 = vst [vmem:[#allocation9] sm:$0xff] %v574_v21  ;;  %v575_v25 = vadd.f32 %v649_v17, %v456_v24 }
 0x20d   :  { %593 = vst [vmem:[#allocation9 + $0x18] sm:$0xff] %v577_v23 }
 0x20e   :  { %591 = vst [vmem:[#allocation9 + $0x8] sm:$0xff] %v575_v25 }
 0x210   :  { %v736_v26 = vpop.f32.mrb[4].mxu1 }
 0x211   :  { %v580_v27 = vadd.f32 %v736_v26, %v649_v17  ;;  %v469_v28 = vpop.f32.mrb[5].mxu1 }
 0x212   :  { %v578_v29 = vadd.f32 %v649_v17, %v469_v28  ;;  %v737_v30 = vpop.f32.mrb[6].mxu1 }
 0x213   :  { %596 = vst [vmem:[#allocation9 + $0x30] sm:$0xff] %v580_v27  ;;  %v581_v31 = vadd.f32 %v737_v30, %v649_v17  ;;  %v472_v32 = vpop.f32.mrb[7].mxu1 }
 0x214   :  { %594 = vst [vmem:[#allocation9 + $0x20] sm:$0xff] %v578_v29  ;;  %v579_v33 = vadd.f32 %v649_v17, %v472_v32 }
 0x215   :  { %597 = vst [vmem:[#allocation9 + $0x38] sm:$0xff] %v581_v31 }
 0x216   :  { %595 = vst [vmem:[#allocation9 + $0x28] sm:$0xff] %v579_v33 }
 0x218   :  { %v740_v34 = vpop.f32.mrb[8].mxu1 }
 0x219   :  { %v584_v35 = vadd.f32 %v740_v34, %v649_v17  ;;  %v485_v36 = vpop.f32.mrb[9].mxu1 }
 0x21a   :  { %v582_v37 = vadd.f32 %v649_v17, %v485_v36  ;;  %v741_v38 = vpop.f32.mrb[10].mxu1 }
 0x21b   :  { %600 = vst [vmem:[#allocation9 + $0x50] sm:$0xff] %v584_v35  ;;  %v585_v39 = vadd.f32 %v741_v38, %v649_v17  ;;  %v488_v40 = vpop.f32.mrb[11].mxu1 }
 0x21c   :  { %598 = vst [vmem:[#allocation9 + $0x40] sm:$0xff] %v582_v37  ;;  %v583_v41 = vadd.f32 %v649_v17, %v488_v40 }
 0x21d   :  { %601 = vst [vmem:[#allocation9 + $0x58] sm:$0xff] %v585_v39 }
 0x21e   :  { %599 = vst [vmem:[#allocation9 + $0x48] sm:$0xff] %v583_v41 }
 0x220   :  { %v744_v42 = vpop.f32.mrb[12].mxu1 }
 0x221   :  { %v588_v43 = vadd.f32 %v744_v42, %v649_v17  ;;  %v501_v44 = vpop.f32.mrb[13].mxu1 }
 0x222   :  { %v586_v45 = vadd.f32 %v649_v17, %v501_v44  ;;  %v745_v46 = vpop.f32.mrb[14].mxu1 }
 0x223   :  { %604 = vst [vmem:[#allocation9 + $0x70] sm:$0xff] %v588_v43  ;;  %v589_v47 = vadd.f32 %v745_v46, %v649_v17  ;;  %v504_v48 = vpop.f32.mrb[15].mxu1 }
 0x224   :  { %602 = vst [vmem:[#allocation9 + $0x60] sm:$0xff] %v586_v45  ;;  %v587_v49 = vadd.f32 %v649_v17, %v504_v48 }
 0x225   :  { %605 = vst [vmem:[#allocation9 + $0x78] sm:$0xff] %v589_v47 }
 0x226   :  { %603 = vst [vmem:[#allocation9 + $0x68] sm:$0xff] %v587_v49 }
 0x227   :  { %855 = shalt.err (!%p852_p0)
}
 0x228   :  { %s856_s10 = scalar_lea.hbm %s985_s5, 2048 }
 0x229   :  { %p857_p1 = scmp.ne.s32.totalorder %s985_s5, %s856_s10  ;;  %p860_p2 = scmp.lt.u32.totalorder %s856_s10, %s985_s5 }
 0x22b   :  { %p862_p3 = pnand %p860_p2, %p857_p1 }
 0x22d   :  { %865 = shalt.err (!%p862_p3)
}
 0x22e   :  { %s878_s15 = smov 128   ;;  %s879_s16 = smov 8  }
 0x22f   :  { %617 = dma.vmem_to_hbm [thread:$0]  %s612_s6, 2048, %s985_s5, [#allocation5], %s878_s15, %s878_s15, %s879_s16  }
 0x230   :  { %870 = dma.done.wait [#allocation5], 2048  }
 0x231   :  { %871 = vsyncadd [#allocation5], 4294965248 }
 0x232   :  { %621 = vsyncpa [#allocation4], 1 }
 0x233   :  { %622 = vsyncpa [#allocation7], 1 }
 0x234   :  { %623 = vsyncpa [#allocation5], 1 }

</bundles_post_ra>
